<compile_context>
chip_gen: v7x
topology: tpu7x:2x2x1
jax: 0.10.0
libtpu: 0.0.40
codegen_flags: <defaults>
</compile_context>

<pallas_src>
import functools

import numpy as np

import jax
import jax.numpy as jnp
from jax.experimental import pallas as pl
from jax.experimental.pallas import tpu as pltpu

_LANES = 128


def _cdiv(a, b):
    return -(-a // b)


def _round_up(x, m):
    return _cdiv(x, m) * m


def _default_num_cores():
    """2-way core split only helps on multi-TensorCore chips (v7x); on
    single-TC chips (v5e/v6e) it just forces extra padding.  Best effort."""
    try:
        info = pltpu.get_tpu_info()
        for attr in ("num_cores", "core_count", "num_tensorcores"):
            v = getattr(info, attr, None)
            if v:
                return max(1, min(2, int(v)))
    except Exception:
        pass
    return 1


def _normals_kernel(pred_ref, mcn_ref, out_ref, acc_ref):
    """pred_ref: SMEM f32[3]; mcn_ref: VMEM f32[3, S, 128];
    out_ref: SMEM f32[1, 1] (per-core partial sum); acc_ref: VMEM f32[S, 128]."""
    i = pl.program_id(1)          # reduction steps ("arbitrary")

    px = pred_ref[0]
    py = pred_ref[1]
    pz = pred_ref[2]

    # (S, 128) slabs: points occupy both sublanes and lanes (vreg-dense).
    mx = mcn_ref[0]
    my = mcn_ref[1]
    mz = mcn_ref[2]

    # Lagrange identity (pred is unit norm): ||cross(pred, m)||^2
    #   = ||m||^2 - (pred . m)^2
    mm = mx * mx + my * my + mz * mz
    d = px * mx + py * my + pz * mz
    sq = mm - d * d

    # exp(-sq / 0.25) on the EUP slot.  Padded zero points contribute exactly
    # exp(0) = 1; the wrapper subtracts that count — no in-kernel mask needed.
    val = jnp.exp(sq * jnp.float32(-4.0))

    @pl.when(i == 0)
    def _():
        acc_ref[...] = val          # write, not zero-then-add

    @pl.when(i != 0)
    def _():
        acc_ref[...] += val         # no per-step cross-lane reduce

    @pl.when(i == pl.num_programs(1) - 1)
    def _():
        out_ref[0, 0] = jnp.sum(acc_ref[...])   # single XLU reduce per core


def pack_mcn(mcn, *, rows_per_tile=4096, num_cores=None):
    """Repack mcn (N, 3) -> zero-padded (3, rows_padded, 128).  Call ONCE and
    reuse the result for every forward call (mcn is fixed while n is trained)."""
    mcn = jnp.asarray(mcn, jnp.float32)
    n_points = int(mcn.shape[0])
    if num_cores is None:
        num_cores = _default_num_cores()

    rows = max(1, _cdiv(n_points, _LANES))
    s_rows = _round_up(min(rows_per_tile, _round_up(rows, 8)), 8)
    tiles_total = max(1, _cdiv(rows, s_rows))
    num_cores = max(1, min(num_cores, tiles_total))   # no all-pad core tiles
    tiles_per_core = _cdiv(tiles_total, num_cores)
    rows_padded = tiles_per_core * num_cores * s_rows
    n_padded = rows_padded * _LANES

    # Pad region MUST be exactly zero (each pad point contributes exp(0)=1,
    # which normals_forward_packed subtracts exactly).
    # TODO(synk): store mcn upstream already in (3, N) layout so this transpose
    # is free instead of a materialized HBM pass.
    mcn_pad = jnp.pad(mcn, ((0, n_padded - n_points), (0, 0)))
    mcn_packed = mcn_pad.T.reshape(3, rows_padded, _LANES)

    meta = dict(n_points=n_points, n_padded=n_padded, s_rows=s_rows,
                tiles_per_core=tiles_per_core, num_cores=num_cores)
    return mcn_packed, meta


def normals_forward_packed(n_param, mcn_packed, *, n_points, n_padded,
                           s_rows, tiles_per_core, num_cores):
    """Jittable hot path: no host syncs, no repack.  Returns (e, pred).
    If n_param == 0 the energy is forced to 0 (pred is returned as zeros)."""
    n_param = jnp.asarray(n_param, jnp.float32)
    nrm2 = jnp.sum(n_param ** 2)
    is_zero = nrm2 == jnp.float32(0.0)
    pred = n_param / jnp.sqrt(jnp.where(is_zero, jnp.float32(1.0), nrm2))

    partials = pl.pallas_call(
        _normals_kernel,
        out_shape=jax.ShapeDtypeStruct((num_cores, 1), jnp.float32),
        grid_spec=pltpu.PrefetchScalarGridSpec(
            num_scalar_prefetch=0,
            grid=(num_cores, tiles_per_core),
            in_specs=[
                pl.BlockSpec(memory_space=pltpu.SMEM),                 # pred (3,)
                pl.BlockSpec(
                    (3, s_rows, _LANES),
                    lambda c, i: (0, c * tiles_per_core + i, 0)),      # mcn tile
            ],
            out_specs=pl.BlockSpec((1, 1), lambda c, i: (c, 0),
                                   memory_space=pltpu.SMEM),
            scratch_shapes=[pltpu.VMEM((s_rows, _LANES), jnp.float32)],
        ),
        compiler_params=pltpu.CompilerParams(
            dimension_semantics=("parallel", "arbitrary"),
            vmem_limit_bytes=32 * 1024 * 1024),
    )(pred, mcn_packed)

    pad_count = jnp.float32(n_padded - n_points)   # each pad point added exp(0)=1
    e = jnp.float32(-0.5) * (jnp.sum(partials) - pad_count) / jnp.float32(n_points)
    e = jnp.where(is_zero, jnp.float32(0.0), e)
    return e, pred


def normals_forward(n_param, mcn, *, rows_per_tile=4096, num_cores=None):
    """Convenience wrapper matching the PyTorch module exactly, including the
    (pred=None, e=0) branch.  The None branch is decided from the host-resident
    parameter value (tiny optimizer variable); for the training hot loop use
    pack_mcn() once + normals_forward_packed() (jittable, no host sync)."""
    n_host = np.asarray(jax.device_get(n_param), dtype=np.float32)
    if not np.any(n_host):
        return jnp.float32(0.0), None
    mcn_packed, meta = pack_mcn(mcn, rows_per_tile=rows_per_tile,
                                num_cores=num_cores)
    return normals_forward_packed(jnp.asarray(n_param, jnp.float32),
                                  mcn_packed, **meta)


def normals_ref(n_param, mcn):
    """Pure-JAX reference of the PyTorch forward (non-zero-parameter branch)."""
    n_param = jnp.asarray(n_param, jnp.float32)
    mcn = jnp.asarray(mcn, jnp.float32)
    pred = n_param / jnp.sqrt(jnp.sum(n_param ** 2))
    cross = jnp.cross(jnp.broadcast_to(pred, mcn.shape), mcn, axis=-1)
    nrm = jnp.linalg.norm(cross, axis=1)
    e = -0.5 * jnp.mean(jnp.exp(-(nrm ** 2) / 0.25))
    return e, pred


if __name__ == "__main__":
    key = jax.random.PRNGKey(0)
    # Deterministic parameter init, same as the module: n = [1, 0, 0]
    n_param = jnp.array([1.0, 0.0, 0.0], dtype=jnp.float32)

    # One 128-aligned size, one ragged size (exercises the pad-count correction).
    for n_pts in (256, 300):
        mcn = jax.random.normal(jax.random.fold_in(key, n_pts),
                                (n_pts, 3), dtype=jnp.float32)

        # Hot-loop path: pack once, reuse across every (jitted) forward call.
        mcn_packed, meta = pack_mcn(mcn)
        fwd = jax.jit(
            functools.partial(normals_forward_packed, **meta))
        e, pred = fwd(n_param, mcn_packed)
        e = jax.block_until_ready(e)

        e_ref, pred_ref = normals_ref(n_param, mcn)
        assert pred is not None
        assert jnp.allclose(pred, pred_ref, atol=1e-6), (pred, pred_ref)
        assert abs(float(e) - float(e_ref)) < 1e-5, (n_pts, float(e), float(e_ref))

        # Convenience path (PyTorch-compatible wrapper).
        e2, pred2 = normals_forward(n_param, mcn)
        e2 = jax.block_until_ready(e2)
        assert abs(float(e2) - float(e_ref)) < 1e-5, (n_pts, float(e2), float(e_ref))

    # Zero-parameter branch (host-side, matches the PyTorch module).
    e0, pred0 = normals_forward(jnp.zeros(3, jnp.float32),
                                jax.random.normal(key, (64, 3), jnp.float32))
    assert pred0 is None and float(e0) == 0.0

    print("KERNEL_OK")
</pallas_src>

<mosaic_0001>
module attributes {stable_mosaic.version = 11 : i64} {
  func.func @_normals_kernel(%arg0: i32, %arg1: i32, %arg2: memref<3xf32, #tpu.memory_space<smem>>, %arg3: memref<3x8x128xf32, #tpu.memory_space<vmem>>, %arg4: memref<1x1xf32, #tpu.memory_space<smem>>, %arg5: memref<8x128xf32, #tpu.memory_space<vmem>>) attributes {dimension_semantics = [#tpu.dimension_semantics<parallel>, #tpu.dimension_semantics<arbitrary>], iteration_bounds = array<i64: 1, 1>, scalar_prefetch = 0 : i64, scratch_operands = 1 : i64, tpu.core_type = #tpu.core_type<tc>, window_params = [{transform_indices = @transform_0, window_bounds = array<i64: 3>}, {transform_indices = @transform_1, window_bounds = array<i64: 3, 8, 128>}, {transform_indices = @transform_2, window_bounds = array<i64: 1, 1>}]} {
    %c0 = arith.constant 0 : index
    %0 = memref.load %arg2[%c0] : memref<3xf32, #tpu.memory_space<smem>>
    %c1 = arith.constant 1 : index
    %1 = memref.load %arg2[%c1] : memref<3xf32, #tpu.memory_space<smem>>
    %c2 = arith.constant 2 : index
    %2 = memref.load %arg2[%c2] : memref<3xf32, #tpu.memory_space<smem>>
    %c0_0 = arith.constant 0 : index
    %c0_1 = arith.constant 0 : index
    %c0_2 = arith.constant 0 : index
    %3 = vector.load %arg3[%c0_0, %c0_1, %c0_2] : memref<3x8x128xf32, #tpu.memory_space<vmem>>, vector<1x8x128xf32>
    %4 = vector.shape_cast %3 : vector<1x8x128xf32> to vector<8x128xf32>
    %c1_3 = arith.constant 1 : index
    %c0_4 = arith.constant 0 : index
    %c0_5 = arith.constant 0 : index
    %5 = vector.load %arg3[%c1_3, %c0_4, %c0_5] : memref<3x8x128xf32, #tpu.memory_space<vmem>>, vector<1x8x128xf32>
    %6 = vector.shape_cast %5 : vector<1x8x128xf32> to vector<8x128xf32>
    %c2_6 = arith.constant 2 : index
    %c0_7 = arith.constant 0 : index
    %c0_8 = arith.constant 0 : index
    %7 = vector.load %arg3[%c2_6, %c0_7, %c0_8] : memref<3x8x128xf32, #tpu.memory_space<vmem>>, vector<1x8x128xf32>
    %8 = vector.shape_cast %7 : vector<1x8x128xf32> to vector<8x128xf32>
    %9 = arith.mulf %4, %4 : vector<8x128xf32>
    %10 = arith.mulf %6, %6 : vector<8x128xf32>
    %11 = arith.addf %9, %10 : vector<8x128xf32>
    %12 = arith.mulf %8, %8 : vector<8x128xf32>
    %13 = arith.addf %11, %12 : vector<8x128xf32>
    %14 = vector.broadcast %0 : f32 to vector<8x128xf32>
    %15 = arith.mulf %14, %4 : vector<8x128xf32>
    %16 = vector.broadcast %1 : f32 to vector<8x128xf32>
    %17 = arith.mulf %16, %6 : vector<8x128xf32>
    %18 = arith.addf %15, %17 : vector<8x128xf32>
    %19 = vector.broadcast %2 : f32 to vector<8x128xf32>
    %20 = arith.mulf %19, %8 : vector<8x128xf32>
    %21 = arith.addf %18, %20 : vector<8x128xf32>
    %22 = arith.mulf %21, %21 : vector<8x128xf32>
    %23 = arith.subf %13, %22 : vector<8x128xf32>
    %cst = arith.constant -4.000000e+00 : f32
    %24 = vector.broadcast %cst : f32 to vector<8x128xf32>
    %25 = arith.mulf %23, %24 : vector<8x128xf32>
    %26 = math.exp %25 : vector<8x128xf32>
    %c0_i32 = arith.constant 0 : i32
    %27 = arith.cmpi eq, %arg1, %c0_i32 : i32
    %28 = arith.extui %27 : i1 to i32
    %c0_i32_9 = arith.constant 0 : i32
    %29 = arith.cmpi ne, %28, %c0_i32_9 : i32
    scf.if %29 {
      %c0_14 = arith.constant 0 : index
      %c0_15 = arith.constant 0 : index
      %36 = vector.load %arg5[%c0_14, %c0_15] : memref<8x128xf32, #tpu.memory_space<vmem>>, vector<8x128xf32>
      tpu.vector_store %arg5[%c0_14, %c0_15], %26 {strides = array<i32>} : memref<8x128xf32, #tpu.memory_space<vmem>>, vector<8x128xf32>,
    } else {
    }
    %c0_i32_10 = arith.constant 0 : i32
    %30 = arith.cmpi ne, %arg1, %c0_i32_10 : i32
    %31 = arith.extui %30 : i1 to i32
    %c0_i32_11 = arith.constant 0 : i32
    %32 = arith.cmpi ne, %31, %c0_i32_11 : i32
    scf.if %32 {
      %c0_14 = arith.constant 0 : index
      %c0_15 = arith.constant 0 : index
      %36 = vector.load %arg5[%c0_14, %c0_15] : memref<8x128xf32, #tpu.memory_space<vmem>>, vector<8x128xf32>
      %37 = arith.addf %36, %26 : vector<8x128xf32>
      %c0_16 = arith.constant 0 : index
      %c0_17 = arith.constant 0 : index
      %38 = vector.load %arg5[%c0_16, %c0_17] : memref<8x128xf32, #tpu.memory_space<vmem>>, vector<8x128xf32>
      tpu.vector_store %arg5[%c0_16, %c0_17], %37 {strides = array<i32>} : memref<8x128xf32, #tpu.memory_space<vmem>>, vector<8x128xf32>,
    } else {
    }
    %c0_i32_12 = arith.constant 0 : i32
    %33 = arith.cmpi eq, %arg1, %c0_i32_12 : i32
    %34 = arith.extui %33 : i1 to i32
    %c0_i32_13 = arith.constant 0 : i32
    %35 = arith.cmpi ne, %34, %c0_i32_13 : i32
    scf.if %35 {
      %c0_14 = arith.constant 0 : index
      %c0_15 = arith.constant 0 : index
      %36 = vector.load %arg5[%c0_14, %c0_15] : memref<8x128xf32, #tpu.memory_space<vmem>>, vector<8x128xf32>
      %37 = vector.shape_cast %36 : vector<8x128xf32> to vector<1x8x128xf32>
      %cst_16 = arith.constant dense<0.000000e+00> : vector<1xf32>
      %38 = vector.multi_reduction <add>, %37, %cst_16 [1, 2] : vector<1x8x128xf32> to vector<1xf32>
      %39 = vector.shape_cast %38 : vector<1xf32> to vector<1x1x1xf32>
      %40 = vector.extract %39[0, 0, 0] : f32 from vector<1x1x1xf32>
      %c0_17 = arith.constant 0 : index
      %c0_18 = arith.constant 0 : index
      %41 = memref.load %arg4[%c0_17, %c0_18] : memref<1x1xf32, #tpu.memory_space<smem>>
      memref.store %40, %arg4[%c0_17, %c0_18] : memref<1x1xf32, #tpu.memory_space<smem>>
    } else {
    }
    return
  }
  func.func @transform_0(%arg0: i32, %arg1: i32) -> i32 {
    %c0_i32 = arith.constant 0 : i32
    %c0_i32_0 = arith.constant 0 : i32
    return %c0_i32 : i32
  }
  func.func @transform_1(%arg0: i32, %arg1: i32) -> (i32, i32, i32) {
    %c1_i32 = arith.constant 1 : i32
    %0 = arith.muli %arg0, %c1_i32 : i32
    %1 = arith.addi %0, %arg1 : i32
    %c0_i32 = arith.constant 0 : i32
    %c0_i32_0 = arith.constant 0 : i32
    %c0_i32_1 = arith.constant 0 : i32
    return %c0_i32, %1, %c0_i32_0 : i32, i32, i32
  }
  func.func @transform_2(%arg0: i32, %arg1: i32) -> (i32, i32) {
    %c0_i32 = arith.constant 0 : i32
    %c0_i32_0 = arith.constant 0 : i32
    return %arg0, %c0_i32 : i32, i32
  }
}

</mosaic_0001>

<bundles_post_ra>
// kernel: normals_forward_packed.1
= control target key start
LH: loop header
LB: loop body
LE: loop exit
PB: predicated region body
PF: predicated region fallthrough
CT: control target
= control target key end

     0   :  { %7 = vsyncpa [#allocation6], 0  ;;  %s219_s0 = inlined_call_operand.vmem [shape: f32[3], index: 0, kind: input, shape index: {}]   ;;  %s220_s1 = inlined_call_operand.hbm [shape: f32[3,8,128], index: 1, kind: input, shape index: {}]   ;;  %s221_s2 = inlined_call_operand.hbm [shape: f32[1,1], index: 2, kind: output, shape index: {}]  }
   0x1   :  { %8 = vsyncpa [#allocation4], 0 }
   0x2   :  { %9 = vsyncpa [#allocation5], 0  ;;  %s16_s11 = sshll.u32 %s219_s0, 4  ;;  %s17_s11 = int_to_ptr.vmem [resolvable:$true] %s16_s11 }
   0x3   :  { %s122_s12 = scalar_lea.vmem %s17_s11, 16  ;;  %p127_p1 = scmp.lt.s32.totalorder %s17_s11, %s17_s11 }
   0x4   :  { %p123_p0 = scmp.ne.s32.totalorder %s17_s11, %s122_s12  ;;  %p128_p2 = scmp.lt.s32.totalorder %s122_s12, %s122_s12 }
   0x6   :  { %p129_p3 = por %p128_p2, %p127_p1 }
   0x8   :  { %p130_p4 = pnand %p129_p3, %p123_p0 }
   0xa   :  { %133 = shalt.err (!%p130_p4)
}
   0xb   :  { %s172_s13 = smov [#allocation3]   ;;  %s173_s14 = smov [#allocation7]  }
   0xc   :  { %19 = dma.vmem_to_smem %s17_s11, 16, %s172_s13, [#allocation6]  }
   0xd   :  { %s28_s15 = sshll.u32 %s173_s14, 4  ;;  %s134_s18 = scalar_lea.hbm %s220_s1, 384  ;;  %s29_s15 = int_to_ptr.vmem [resolvable:$true] %s28_s15 }
   0xe   :  { %p135_p5 = scmp.ne.s32.totalorder %s220_s1, %s134_s18  ;;  %p138_p6 = scmp.lt.u32.totalorder %s134_s18, %s220_s1 }
  0x10   :  { %p140_p7 = pnand %p138_p6, %p135_p5 }
  0x12   :  { %143 = shalt.err (!%p140_p7)
}
  0x13   :  { %s144_s22 = scalar_lea.vmem %s29_s15, 384  ;;  %p149_p9 = scmp.lt.s32.totalorder %s29_s15, %s29_s15 }
  0x14   :  { %p145_p8 = scmp.ne.s32.totalorder %s29_s15, %s144_s22  ;;  %p150_p10 = scmp.lt.s32.totalorder %s144_s22, %s144_s22 }
  0x16   :  { %p151_p11 = por %p150_p10, %p149_p9 }
  0x18   :  { %p152_p12 = pnand %p151_p11, %p145_p8 }
  0x1a   :  { %155 = shalt.err (!%p152_p12)
}
  0x1b   :  { %s174_s23 = smov 128   ;;  %s175_s24 = smov 8  }
  0x1c   :  { %34 = dma.hbm_to_vmem [thread:$0]  %s220_s1, 384, %s29_s15, [#allocation4], %s174_s23, %s174_s23, %s175_s24  }
  0x1d   :  { %166 = dma.done.wait [#allocation6], 16  }
  0x1e   :  { %167 = vsyncadd [#allocation6], 4294967280 }
  0x1f   :  { %168 = dma.done.wait [#allocation4], 384  }
  0x20   :  { %169 = vsyncadd [#allocation4], 4294966912 }
  0x21   :  { %41 = sfence }
  0x22   :  { %s43_s27 = sld [smem:[#allocation3]]  ;;  %s111_s28 = sld [smem:[#allocation3 + $0x1]]  ;;  %v46_v0 = vld [vmem:[#allocation7] sm:$0xff]  ;;  %v48_v1 = vld [vmem:[#allocation7 + $0x8] sm:$0xff]  ;;  %v50_v4 = vld [vmem:[#allocation7 + $0x10] sm:$0xff] }
  0x23   :  { %s112_s29 = sld [smem:[#allocation3 + $0x2]]  ;;  %v51_v2 = vmul.f32 %v46_v0, %v46_v0  ;;  %v52_v3 = vmul.f32 %v48_v1, %v48_v1  ;;  %v54_v5 = vmul.f32 %v50_v4, %v50_v4  ;;  %s156_s4 = scalar_lea.hbm %s221_s2, 16 }
  0x24   :  { %p157_p13 = scmp.ne.s32.totalorder %s221_s2, %s156_s4  ;;  %p160_p0 = scmp.lt.u32.totalorder %s156_s4, %s221_s2 }
  0x25   :  { %v53_v8 = vadd.f32 %v52_v3, %v51_v2 }
  0x26   :  { %p162_p1 = pnand %p160_p0, %p157_p13 }
  0x27   :  { %v55_v14 = vadd.f32 %v54_v5, %v53_v8 }
  0x28   :  { %v56_v6 = vstv %s43_s27  ;;  %v58_v7 = vstv %s111_s28 }
  0x29   :  { %v57_v9 = vmul.f32 %v56_v6, %v46_v0  ;;  %v59_v10 = vmul.f32 %v58_v7, %v48_v1  ;;  %v61_v11 = vstv %s112_s29 }
  0x2a   :  { %v62_v12 = vmul.f32 %v61_v11, %v50_v4 }
  0x2b   :  { %v60_v13 = vadd.f32 %v59_v10, %v57_v9 }
  0x2d   :  { %v63_v15 = vadd.f32 %v62_v12, %v60_v13 }
  0x2f   :  { %v64_v16 = vmul.f32 %v63_v15, %v63_v15 }
  0x31   :  { %v65_v17 = vsub.f32 %v55_v14, %v64_v16 }
  0x33   :  { %v66_v18 = vmul.f32 -4.0, %v65_v17 }
  0x35   :  { %v67_v19 = vmul.f32 1.442695, %v66_v18 }
  0x37   :  { %120 = vpow2.f32 %v67_v19 }
  0x41   :  { %v121_v20 = vpop.eup %120 }
  0x42   :  { %85 = vadd.xlane.f32.xlu0 %v121_v20 }
  0xcf   :  { %v86_v21 = vpop.xlane.xlu0 %85 }
  0xd0   :  { %v87_v22 = vrot.slane %v86_v21, 4 }
  0xd2   :  { %v88_v23 = vadd.f32 %v87_v22, %v86_v21 }
  0xd4   :  { %v89_v24 = vrot.slane %v88_v23, 2 }
  0xd6   :  { %v90_v25 = vadd.f32 %v89_v24, %v88_v23 }
  0xd8   :  { %v91_v26 = vrot.slane %v90_v25, 1 }
  0xda   :  { %v92_v27 = vadd.f32 %v91_v26, %v90_v25 }
  0xdc   :  { %113 = vpush %v92_v27 }
 0x10d   :  { %s114_s1 = spop %113 }
 0x10e   :  { %95 = sst [smem:[#allocation8]] %s114_s1 }
 0x10f   :  { %165 = shalt.err (!%p162_p1)
}
 0x110   :  { %s176_s9 = smov [#allocation8]  }
 0x111   :  { %103 = dma.smem_to_hbm %s176_s9, 16, %s221_s2, [#allocation5]  }
 0x112   :  { %170 = dma.done.wait [#allocation5], 16  }
 0x113   :  { %171 = vsyncadd [#allocation5], 4294967280 }
 0x114   :  { %107 = sfence }
 0x115   :  { %108 = vsyncpa [#allocation4], 1 }
 0x116   :  { %109 = vsyncpa [#allocation5], 1 }
 0x117   :  { %110 = vsyncpa [#allocation6], 1 }

</bundles_post_ra>
